<compile_context>
chip_gen: v5e
topology: v5e:2x2
jax: 0.10.0
libtpu: 0.0.40
codegen_flags: <defaults>
</compile_context>

<pallas_src>
import jax
import jax.numpy as jnp
from jax.experimental import pallas as pl
from jax.experimental.pallas import tpu as pltpu


def _itat_kernel(ht_ref, kt_ref, c_ref, nodes_ref, w_ref, b_ref, out_ref):
    """One batch tile of InputTreeAttention.

    ht_ref    : (TB, H) f32   decoder states h_t (one row per query)
    kt_ref    : (H,  S) f32   (node_h @ W0)^T           -- W0 folded host-side
    c_ref     : (1,  S) f32   node_h @ b0               -- b0 folded host-side
    nodes_ref : (S,  H) f32   stacked node hidden states (shared by all queries)
    w_ref     : (2H, H) bf16  packed, pre-transposed weights [W1^T ; W2^T]
    b_ref     : (1,  H) f32   b1 + b2
    out_ref   : (TB, H) f32   e_t
    """
    h = w_ref.shape[1]
    ht = ht_ref[...]                                                     # (TB, H)

    # scores[q, s] = <node_s, W0 h_q + b0>  -- single small MXU pass (S << H).
    scores = jnp.dot(ht, kt_ref[...],
                     preferred_element_type=jnp.float32) + c_ref[...]    # (TB, S)

    # Module semantics: w = softmax(exp(scores)) over the node axis (double exp is
    # intentional, matching the PyTorch reference; assumes scores stay < ~88).
    ew = jnp.exp(scores)
    m = jnp.max(ew, axis=-1, keepdims=True)
    p = jnp.exp(ew - m)
    denom = jnp.sum(p, axis=-1, keepdims=True)                           # (TB, 1)
    inv = pl.reciprocal(denom, approx=True)            # EUP slot (≈ free)
    inv = inv * (2.0 - denom * inv)                    # 1 Newton step -> ~f32 accuracy
    wn = p * inv                                                         # (TB, S)

    # e_s = sum_s w[s] * node_s  -- MXU matmul rather than a sublane reduce.
    e_s = jnp.dot(wn, nodes_ref[...],
                  preferred_element_type=jnp.float32)                    # (TB, H)

    # tanh(e_s @ W1^T + h_t @ W2^T + (b1 + b2)) as two accumulated bf16 MXU dots
    # (no (TB, 2H) concat temp).
    w1t = w_ref[0:h, :]
    w2t = w_ref[h:2 * h, :]
    y = jnp.dot(e_s.astype(w1t.dtype), w1t, preferred_element_type=jnp.float32)
    y = y + jnp.dot(ht.astype(w2t.dtype), w2t, preferred_element_type=jnp.float32)
    y = y + b_ref[...]
    out_ref[...] = jnp.tanh(y).astype(out_ref.dtype)


def _round_up(x, m):
    return ((x + m - 1) // m) * m


def input_tree_attention(node_h, h_t, params, *, block_b=256):
    """Batched InputTreeAttention.

    node_h : (S, H) stacked node hidden states of the tree.
    h_t    : (B, H) batch of decoder states (B independent queries vs the same tree).
    params : (W0, b0, W1, b1, W2, b2) with W* of shape (H, H), b* of shape (H,).
    Returns e_t of shape (B, H); row b equals the module applied to h_t[b:b+1].
    """
    W0, b0, W1, b1, W2, b2 = params
    S, H = node_h.shape
    B = h_t.shape[0]

    # ---- Host-side algebra / packing -------------------------------------------
    node_f32 = node_h.astype(jnp.float32)
    # W0 eliminated from the kernel (associativity): scores = h_t @ kT + c.
    kT = (node_f32 @ W0.astype(jnp.float32)).T                 # (H, S) f32
    c = (node_f32 @ b0.astype(jnp.float32)).reshape(1, S)      # (1, S) f32
    # Packed output-projection weights in bf16 (dominant HBM / VMEM slab).
    w12 = jnp.concatenate([W1.T, W2.T], axis=0).astype(jnp.bfloat16)   # (2H, H)
    b12 = (b1 + b2).reshape(1, H).astype(jnp.float32)                  # (1, H)

    # ---- Batch tiling ------------------------------------------------------------
    tb = min(_round_up(block_b, 8), _round_up(B, 8))
    # Ensure >= 2 grid steps when B allows, so v7x's two TensorCores both get work.
    if _round_up(B, tb) // tb < 2 and B > 8:
        tb = _round_up(pl.cdiv(B, 2), 8)
    b_pad = _round_up(B, tb)
    h_t_in = h_t.astype(jnp.float32)
    if b_pad != B:
        h_t_in = jnp.pad(h_t_in, ((0, b_pad - B), (0, 0)))

    # ---- VMEM budget (explicit; v5e scoped default is only 16 MiB) ---------------
    nbytes = lambda a: int(a.size) * a.dtype.itemsize
    resident_bytes = nbytes(kT) + nbytes(c) + nbytes(node_f32) + nbytes(w12) + nbytes(b12)
    tile_bytes = tb * H * 4
    vmem_limit = int(min(max(2 * resident_bytes + 4 * tile_bytes + (2 << 20), 16 << 20),
                         56 << 20))   # stay under v7x's 64 MiB physical VMEM

    def _in_specs(resident_mode):
        kw = {} if resident_mode is None else {"pipeline_mode": resident_mode}
        return [
            pl.BlockSpec((tb, H), lambda i: (i, 0)),              # h_t: blocked over batch
            pl.BlockSpec((H, S), lambda i: (0, 0), **kw),         # kT: resident
            pl.BlockSpec((1, S), lambda i: (0, 0), **kw),         # c: resident
            pl.BlockSpec((S, H), lambda i: (0, 0), **kw),         # node states: resident
            pl.BlockSpec((2 * H, H), lambda i: (0, 0), **kw),     # packed weights: resident
            pl.BlockSpec((1, H), lambda i: (0, 0), **kw),         # packed bias: resident
        ]

    def _run(in_specs):
        out = pl.pallas_call(
            _itat_kernel,
            out_shape=jax.ShapeDtypeStruct((b_pad, H), jnp.float32),
            grid=(b_pad // tb,),
            in_specs=in_specs,
            out_specs=pl.BlockSpec((tb, H), lambda i: (i, 0)),
            compiler_params=pltpu.CompilerParams(
                dimension_semantics=("parallel",),   # shard batch tiles across TCs (v7x)
                vmem_limit_bytes=vmem_limit,
            ),
        )(h_t_in, kT, c, node_f32, w12, b12)
        return jax.block_until_ready(out)

    try:
        # Single-buffer the constant-index operands (the weight slab then occupies
        # 1x instead of 2x its size in VMEM).
        out = _run(_in_specs(pl.Buffered(1)))
    except Exception:
        # Fallback for builds where pipeline_mode=Buffered(1) is not supported by
        # the main pallas_call pipeline: default double-buffering (still correct).
        out = _run(_in_specs(None))
    return out[:B]


def _reference(node_h, h_t, params):
    """Pure-JAX reference matching the PyTorch module row-by-row (full f32)."""
    W0, b0, W1, b1, W2, b2 = params
    h0 = h_t @ W0.T + b0                         # (B, H)
    w = jnp.exp(h0 @ node_h.T)                   # (B, S) = exp(scores)
    w = jax.nn.softmax(w, axis=-1)               # softmax over the node axis
    e_s = w @ node_h                             # (B, H)
    return jnp.tanh(e_s @ W1.T + b1 + h_t @ W2.T + b2)


def _make_params(key, h_dim):
    # Deterministic nn.Linear-style init: U(-1/sqrt(fan_in), 1/sqrt(fan_in))
    bound = 1.0 / (h_dim ** 0.5)
    keys = jax.random.split(key, 6)
    mk = lambda k, shape: jax.random.uniform(k, shape, jnp.float32, -bound, bound)
    W0 = mk(keys[0], (h_dim, h_dim)); b0 = mk(keys[1], (h_dim,))
    W1 = mk(keys[2], (h_dim, h_dim)); b1 = mk(keys[3], (h_dim,))
    W2 = mk(keys[4], (h_dim, h_dim)); b2 = mk(keys[5], (h_dim,))
    return (W0, b0, W1, b1, W2, b2)


if __name__ == "__main__":
    # Small but TPU-friendly shapes: H lane-dense (multiple of 128), S a sublane
    # multiple, B small enough that the >=2-grid-step rule kicks in (grid of 2).
    S, H, B = 8, 128, 16
    key = jax.random.PRNGKey(0)
    k_nodes, k_ht, k_par = jax.random.split(key, 3)

    # Modest input scale keeps the module's double exponential (exp then softmax)
    # well-conditioned so the kernel/reference comparison is meaningful.
    node_h = 0.25 * jax.random.normal(k_nodes, (S, H), jnp.float32)
    h_t = 0.25 * jax.random.normal(k_ht, (B, H), jnp.float32)
    params = _make_params(k_par, H)

    e_t = input_tree_attention(node_h, h_t, params)
    e_t = jax.block_until_ready(e_t)

    ref = _reference(node_h, h_t, params)
    assert e_t.shape == (B, H)
    err = float(jnp.max(jnp.abs(e_t - ref)))
    # Tolerance covers bf16 rounding of the W1/W2 slab + cast activations at the
    # final projection, MXU pass-precision differences, and the EUP approximate
    # reciprocal (+ Newton step).  The score path is kept f32 end-to-end.
    assert jnp.allclose(e_t, ref, atol=2e-2, rtol=2e-2), (
        f"mismatch vs reference (max|diff|={err:.3e})")

    print("KERNEL_OK")
</pallas_src>

<mosaic_0001>
module attributes {stable_mosaic.version = 11 : i64} {
  func.func @_itat_kernel(%arg0: i32, %arg1: memref<8x128xf32, #tpu.memory_space<vmem>>, %arg2: memref<128x8xf32, #tpu.memory_space<vmem>>, %arg3: memref<1x8xf32, #tpu.memory_space<vmem>>, %arg4: memref<8x128xf32, #tpu.memory_space<vmem>>, %arg5: memref<256x128xbf16, #tpu.memory_space<vmem>>, %arg6: memref<1x128xf32, #tpu.memory_space<vmem>>, %arg7: memref<8x128xf32, #tpu.memory_space<vmem>>) attributes {dimension_semantics = [#tpu.dimension_semantics<parallel>], iteration_bounds = array<i64: 2>, scalar_prefetch = 0 : i64, scratch_operands = 0 : i64, tpu.core_type = #tpu.core_type<tc>, window_params = [{transform_indices = @transform_0, window_bounds = array<i64: 8, 128>}, {pipeline_mode = #tpu.pipeline_mode<synchronous>, transform_indices = @transform_1, window_bounds = array<i64: 128, 8>}, {pipeline_mode = #tpu.pipeline_mode<synchronous>, transform_indices = @transform_2, window_bounds = array<i64: 1, 8>}, {pipeline_mode = #tpu.pipeline_mode<synchronous>, transform_indices = @transform_3, window_bounds = array<i64: 8, 128>}, {pipeline_mode = #tpu.pipeline_mode<synchronous>, transform_indices = @transform_4, window_bounds = array<i64: 256, 128>}, {pipeline_mode = #tpu.pipeline_mode<synchronous>, transform_indices = @transform_5, window_bounds = array<i64: 1, 128>}, {transform_indices = @transform_6, window_bounds = array<i64: 8, 128>}]} {
    %c0 = arith.constant 0 : index
    %c0_0 = arith.constant 0 : index
    %0 = vector.load %arg1[%c0, %c0_0] : memref<8x128xf32, #tpu.memory_space<vmem>>, vector<8x128xf32>
    %c0_1 = arith.constant 0 : index
    %c0_2 = arith.constant 0 : index
    %1 = vector.load %arg2[%c0_1, %c0_2] : memref<128x8xf32, #tpu.memory_space<vmem>>, vector<128x8xf32>
    %cst = arith.constant dense<0.000000e+00> : vector<8x8xf32>
    %2 = tpu.matmul %0, %1, %cst {dimension_numbers = #tpu.dot_dimension_numbers<[1], [0], [0], [1], [0, 0, 1, 1], [], []>} : vector<8x128xf32>, vector<128x8xf32>, vector<8x8xf32> -> vector<8x8xf32>
    %c0_3 = arith.constant 0 : index
    %c0_4 = arith.constant 0 : index
    %3 = vector.load %arg3[%c0_3, %c0_4] : memref<1x8xf32, #tpu.memory_space<vmem>>, vector<1x8xf32>
    %4 = vector.broadcast %3 : vector<1x8xf32> to vector<8x8xf32>
    %5 = arith.addf %2, %4 : vector<8x8xf32>
    %6 = math.exp %5 : vector<8x8xf32>
    %cst_5 = arith.constant dense<0xFF800000> : vector<8xf32>
    %7 = vector.multi_reduction <maximumf>, %6, %cst_5 [1] : vector<8x8xf32> to vector<8xf32>
    %8 = vector.shape_cast %7 : vector<8xf32> to vector<8x1xf32>
    %9 = vector.broadcast %8 : vector<8x1xf32> to vector<8x8xf32>
    %10 = arith.subf %6, %9 : vector<8x8xf32>
    %11 = math.exp %10 : vector<8x8xf32>
    %cst_6 = arith.constant dense<0.000000e+00> : vector<8xf32>
    %12 = vector.multi_reduction <add>, %11, %cst_6 [1] : vector<8x8xf32> to vector<8xf32>
    %13 = vector.shape_cast %12 : vector<8xf32> to vector<8x1xf32>
    %14 = tpu.reciprocal %13 {approx = true} : vector<8x1xf32> -> vector<8x1xf32>
    %15 = arith.mulf %13, %14 : vector<8x1xf32>
    %cst_7 = arith.constant 2.000000e+00 : f32
    %16 = vector.broadcast %cst_7 : f32 to vector<8x1xf32>
    %17 = arith.subf %16, %15 : vector<8x1xf32>
    %18 = arith.mulf %14, %17 : vector<8x1xf32>
    %19 = vector.broadcast %18 : vector<8x1xf32> to vector<8x8xf32>
    %20 = arith.mulf %11, %19 : vector<8x8xf32>
    %c0_8 = arith.constant 0 : index
    %c0_9 = arith.constant 0 : index
    %21 = vector.load %arg4[%c0_8, %c0_9] : memref<8x128xf32, #tpu.memory_space<vmem>>, vector<8x128xf32>
    %cst_10 = arith.constant dense<0.000000e+00> : vector<8x128xf32>
    %22 = tpu.matmul %20, %21, %cst_10 {dimension_numbers = #tpu.dot_dimension_numbers<[1], [0], [0], [1], [0, 0, 1, 1], [], []>} : vector<8x8xf32>, vector<8x128xf32>, vector<8x128xf32> -> vector<8x128xf32>
    %c0_11 = arith.constant 0 : index
    %c0_12 = arith.constant 0 : index
    %23 = vector.load %arg5[%c0_11, %c0_12] : memref<256x128xbf16, #tpu.memory_space<vmem>>, vector<128x128xbf16>
    %c128 = arith.constant 128 : index
    %c0_13 = arith.constant 0 : index
    %24 = vector.load %arg5[%c128, %c0_13] : memref<256x128xbf16, #tpu.memory_space<vmem>>, vector<128x128xbf16>
    %25 = arith.truncf %22 : vector<8x128xf32> to vector<8x128xbf16>
    %cst_14 = arith.constant dense<0.000000e+00> : vector<8x128xf32>
    %26 = tpu.matmul %25, %23, %cst_14 {dimension_numbers = #tpu.dot_dimension_numbers<[1], [0], [0], [1], [0, 0, 1, 1], [], []>} : vector<8x128xbf16>, vector<128x128xbf16>, vector<8x128xf32> -> vector<8x128xf32>
    %27 = arith.truncf %0 : vector<8x128xf32> to vector<8x128xbf16>
    %cst_15 = arith.constant dense<0.000000e+00> : vector<8x128xf32>
    %28 = tpu.matmul %27, %24, %cst_15 {dimension_numbers = #tpu.dot_dimension_numbers<[1], [0], [0], [1], [0, 0, 1, 1], [], []>} : vector<8x128xbf16>, vector<128x128xbf16>, vector<8x128xf32> -> vector<8x128xf32>
    %29 = arith.addf %26, %28 : vector<8x128xf32>
    %c0_16 = arith.constant 0 : index
    %c0_17 = arith.constant 0 : index
    %30 = vector.load %arg6[%c0_16, %c0_17] : memref<1x128xf32, #tpu.memory_space<vmem>>, vector<1x128xf32>
    %31 = vector.broadcast %30 : vector<1x128xf32> to vector<8x128xf32>
    %32 = arith.addf %29, %31 : vector<8x128xf32>
    %33 = math.tanh %32 : vector<8x128xf32>
    %c0_18 = arith.constant 0 : index
    %c0_19 = arith.constant 0 : index
    %34 = vector.load %arg7[%c0_18, %c0_19] : memref<8x128xf32, #tpu.memory_space<vmem>>, vector<8x128xf32>
    tpu.vector_store %arg7[%c0_18, %c0_19], %33 {strides = array<i32>} : memref<8x128xf32, #tpu.memory_space<vmem>>, vector<8x128xf32>,
    return
  }
  func.func @transform_0(%arg0: i32) -> (i32, i32) {
    %c0_i32 = arith.constant 0 : i32
    %c0_i32_0 = arith.constant 0 : i32
    return %arg0, %c0_i32 : i32, i32
  }
  func.func @transform_1(%arg0: i32) -> (i32, i32) {
    %c0_i32 = arith.constant 0 : i32
    %c0_i32_0 = arith.constant 0 : i32
    %c0_i32_1 = arith.constant 0 : i32
    return %c0_i32, %c0_i32_0 : i32, i32
  }
  func.func @transform_2(%arg0: i32) -> (i32, i32) {
    %c0_i32 = arith.constant 0 : i32
    %c0_i32_0 = arith.constant 0 : i32
    %c0_i32_1 = arith.constant 0 : i32
    return %c0_i32, %c0_i32_0 : i32, i32
  }
  func.func @transform_3(%arg0: i32) -> (i32, i32) {
    %c0_i32 = arith.constant 0 : i32
    %c0_i32_0 = arith.constant 0 : i32
    %c0_i32_1 = arith.constant 0 : i32
    return %c0_i32, %c0_i32_0 : i32, i32
  }
  func.func @transform_4(%arg0: i32) -> (i32, i32) {
    %c0_i32 = arith.constant 0 : i32
    %c0_i32_0 = arith.constant 0 : i32
    %c0_i32_1 = arith.constant 0 : i32
    return %c0_i32, %c0_i32_0 : i32, i32
  }
  func.func @transform_5(%arg0: i32) -> (i32, i32) {
    %c0_i32 = arith.constant 0 : i32
    %c0_i32_0 = arith.constant 0 : i32
    %c0_i32_1 = arith.constant 0 : i32
    return %c0_i32, %c0_i32_0 : i32, i32
  }
  func.func @transform_6(%arg0: i32) -> (i32, i32) {
    %c0_i32 = arith.constant 0 : i32
    %c0_i32_0 = arith.constant 0 : i32
    return %arg0, %c0_i32 : i32, i32
  }
}

module attributes {stable_mosaic.version = 11 : i64} {
  func.func @_itat_kernel(%arg0: i32, %arg1: memref<8x128xf32, #tpu.memory_space<vmem>>, %arg2: memref<128x8xf32, #tpu.memory_space<vmem>>, %arg3: memref<1x8xf32, #tpu.memory_space<vmem>>, %arg4: memref<8x128xf32, #tpu.memory_space<vmem>>, %arg5: memref<256x128xbf16, #tpu.memory_space<vmem>>, %arg6: memref<1x128xf32, #tpu.memory_space<vmem>>, %arg7: memref<8x128xf32, #tpu.memory_space<vmem>>) attributes {dimension_semantics = [#tpu.dimension_semantics<parallel>], iteration_bounds = array<i64: 2>, scalar_prefetch = 0 : i64, scratch_operands = 0 : i64, tpu.core_type = #tpu.core_type<tc>, window_params = [{transform_indices = @transform_0, window_bounds = array<i64: 8, 128>}, {pipeline_mode = #tpu.pipeline_mode<synchronous>, transform_indices = @transform_1, window_bounds = array<i64: 128, 8>}, {pipeline_mode = #tpu.pipeline_mode<synchronous>, transform_indices = @transform_2, window_bounds = array<i64: 1, 8>}, {pipeline_mode = #tpu.pipeline_mode<synchronous>, transform_indices = @transform_3, window_bounds = array<i64: 8, 128>}, {pipeline_mode = #tpu.pipeline_mode<synchronous>, transform_indices = @transform_4, window_bounds = array<i64: 256, 128>}, {pipeline_mode = #tpu.pipeline_mode<synchronous>, transform_indices = @transform_5, window_bounds = array<i64: 1, 128>}, {transform_indices = @transform_6, window_bounds = array<i64: 8, 128>}]} {
    %c0 = arith.constant 0 : index
    %c0_0 = arith.constant 0 : index
    %0 = vector.load %arg1[%c0, %c0_0] : memref<8x128xf32, #tpu.memory_space<vmem>>, vector<8x128xf32>
    %c0_1 = arith.constant 0 : index
    %c0_2 = arith.constant 0 : index
    %1 = vector.load %arg2[%c0_1, %c0_2] : memref<128x8xf32, #tpu.memory_space<vmem>>, vector<128x8xf32>
    %cst = arith.constant dense<0.000000e+00> : vector<8x8xf32>
    %2 = tpu.matmul %0, %1, %cst {dimension_numbers = #tpu.dot_dimension_numbers<[1], [0], [0], [1], [0, 0, 1, 1], [], []>} : vector<8x128xf32>, vector<128x8xf32>, vector<8x8xf32> -> vector<8x8xf32>
    %c0_3 = arith.constant 0 : index
    %c0_4 = arith.constant 0 : index
    %3 = vector.load %arg3[%c0_3, %c0_4] : memref<1x8xf32, #tpu.memory_space<vmem>>, vector<1x8xf32>
    %4 = vector.broadcast %3 : vector<1x8xf32> to vector<8x8xf32>
    %5 = arith.addf %2, %4 : vector<8x8xf32>
    %6 = math.exp %5 : vector<8x8xf32>
    %cst_5 = arith.constant dense<0xFF800000> : vector<8xf32>
    %7 = vector.multi_reduction <maximumf>, %6, %cst_5 [1] : vector<8x8xf32> to vector<8xf32>
    %8 = vector.shape_cast %7 : vector<8xf32> to vector<8x1xf32>
    %9 = vector.broadcast %8 : vector<8x1xf32> to vector<8x8xf32>
    %10 = arith.subf %6, %9 : vector<8x8xf32>
    %11 = math.exp %10 : vector<8x8xf32>
    %cst_6 = arith.constant dense<0.000000e+00> : vector<8xf32>
    %12 = vector.multi_reduction <add>, %11, %cst_6 [1] : vector<8x8xf32> to vector<8xf32>
    %13 = vector.shape_cast %12 : vector<8xf32> to vector<8x1xf32>
    %14 = tpu.reciprocal %13 {approx = true} : vector<8x1xf32> -> vector<8x1xf32>
    %15 = arith.mulf %13, %14 : vector<8x1xf32>
    %cst_7 = arith.constant 2.000000e+00 : f32
    %16 = vector.broadcast %cst_7 : f32 to vector<8x1xf32>
    %17 = arith.subf %16, %15 : vector<8x1xf32>
    %18 = arith.mulf %14, %17 : vector<8x1xf32>
    %19 = vector.broadcast %18 : vector<8x1xf32> to vector<8x8xf32>
    %20 = arith.mulf %11, %19 : vector<8x8xf32>
    %c0_8 = arith.constant 0 : index
    %c0_9 = arith.constant 0 : index
    %21 = vector.load %arg4[%c0_8, %c0_9] : memref<8x128xf32, #tpu.memory_space<vmem>>, vector<8x128xf32>
    %cst_10 = arith.constant dense<0.000000e+00> : vector<8x128xf32>
    %22 = tpu.matmul %20, %21, %cst_10 {dimension_numbers = #tpu.dot_dimension_numbers<[1], [0], [0], [1], [0, 0, 1, 1], [], []>} : vector<8x8xf32>, vector<8x128xf32>, vector<8x128xf32> -> vector<8x128xf32>
    %c0_11 = arith.constant 0 : index
    %c0_12 = arith.constant 0 : index
    %23 = vector.load %arg5[%c0_11, %c0_12] : memref<256x128xbf16, #tpu.memory_space<vmem>>, vector<128x128xbf16>
    %c128 = arith.constant 128 : index
    %c0_13 = arith.constant 0 : index
    %24 = vector.load %arg5[%c128, %c0_13] : memref<256x128xbf16, #tpu.memory_space<vmem>>, vector<128x128xbf16>
    %25 = arith.truncf %22 : vector<8x128xf32> to vector<8x128xbf16>
    %cst_14 = arith.constant dense<0.000000e+00> : vector<8x128xf32>
    %26 = tpu.matmul %25, %23, %cst_14 {dimension_numbers = #tpu.dot_dimension_numbers<[1], [0], [0], [1], [0, 0, 1, 1], [], []>} : vector<8x128xbf16>, vector<128x128xbf16>, vector<8x128xf32> -> vector<8x128xf32>
    %27 = arith.truncf %0 : vector<8x128xf32> to vector<8x128xbf16>
    %cst_15 = arith.constant dense<0.000000e+00> : vector<8x128xf32>
    %28 = tpu.matmul %27, %24, %cst_15 {dimension_numbers = #tpu.dot_dimension_numbers<[1], [0], [0], [1], [0, 0, 1, 1], [], []>} : vector<8x128xbf16>, vector<128x128xbf16>, vector<8x128xf32> -> vector<8x128xf32>
    %29 = arith.addf %26, %28 : vector<8x128xf32>
    %c0_16 = arith.constant 0 : index
    %c0_17 = arith.constant 0 : index
    %30 = vector.load %arg6[%c0_16, %c0_17] : memref<1x128xf32, #tpu.memory_space<vmem>>, vector<1x128xf32>
    %31 = vector.broadcast %30 : vector<1x128xf32> to vector<8x128xf32>
    %32 = arith.addf %29, %31 : vector<8x128xf32>
    %33 = math.tanh %32 : vector<8x128xf32>
    %c0_18 = arith.constant 0 : index
    %c0_19 = arith.constant 0 : index
    %34 = vector.load %arg7[%c0_18, %c0_19] : memref<8x128xf32, #tpu.memory_space<vmem>>, vector<8x128xf32>
    tpu.vector_store %arg7[%c0_18, %c0_19], %33 {strides = array<i32>} : memref<8x128xf32, #tpu.memory_space<vmem>>, vector<8x128xf32>,
    return
  }
  func.func @transform_0(%arg0: i32) -> (i32, i32) {
    %c0_i32 = arith.constant 0 : i32
    %c0_i32_0 = arith.constant 0 : i32
    return %arg0, %c0_i32 : i32, i32
  }
  func.func @transform_1(%arg0: i32) -> (i32, i32) {
    %c0_i32 = arith.constant 0 : i32
    %c0_i32_0 = arith.constant 0 : i32
    %c0_i32_1 = arith.constant 0 : i32
    return %c0_i32, %c0_i32_0 : i32, i32
  }
  func.func @transform_2(%arg0: i32) -> (i32, i32) {
    %c0_i32 = arith.constant 0 : i32
    %c0_i32_0 = arith.constant 0 : i32
    %c0_i32_1 = arith.constant 0 : i32
    return %c0_i32, %c0_i32_0 : i32, i32
  }
  func.func @transform_3(%arg0: i32) -> (i32, i32) {
    %c0_i32 = arith.constant 0 : i32
    %c0_i32_0 = arith.constant 0 : i32
    %c0_i32_1 = arith.constant 0 : i32
    return %c0_i32, %c0_i32_0 : i32, i32
  }
  func.func @transform_4(%arg0: i32) -> (i32, i32) {
    %c0_i32 = arith.constant 0 : i32
    %c0_i32_0 = arith.constant 0 : i32
    %c0_i32_1 = arith.constant 0 : i32
    return %c0_i32, %c0_i32_0 : i32, i32
  }
  func.func @transform_5(%arg0: i32) -> (i32, i32) {
    %c0_i32 = arith.constant 0 : i32
    %c0_i32_0 = arith.constant 0 : i32
    %c0_i32_1 = arith.constant 0 : i32
    return %c0_i32, %c0_i32_0 : i32, i32
  }
  func.func @transform_6(%arg0: i32) -> (i32, i32) {
    %c0_i32 = arith.constant 0 : i32
    %c0_i32_0 = arith.constant 0 : i32
    return %arg0, %c0_i32 : i32, i32
  }
}

</mosaic_0001>

<bundles_post_ra>
// kernel: tpu_custom_call.1
= control target key start
LH: loop header
LB: loop body
LE: loop exit
PB: predicated region body
PF: predicated region fallthrough
CT: control target
= control target key end

     0   :  { %11 = vsyncpa [#allocation3], 0  ;;  %s1124_s0 = inlined_call_operand.hbm [shape: f32[16,128], index: 0, kind: input, shape index: {}]   ;;  %s1125_s1 = inlined_call_operand.vmem [shape: f32[128,8], index: 1, kind: input, shape index: {}]   ;;  %s1126_s2 = inlined_call_operand.vmem [shape: f32[1,8], index: 2, kind: input, shape index: {}]   ;;  %s1127_s3 = inlined_call_operand.vmem [shape: f32[8,128], index: 3, kind: input, shape index: {}]   ;;  %s1128_s4 = inlined_call_operand.vmem [shape: bf16[256,128], index: 4, kind: input, shape index: {}]   ;;  %s1129_s5 = inlined_call_operand.vmem [shape: f32[1,128], index: 5, kind: input, shape index: {}]   ;;  %s1130_s6 = inlined_call_operand.hbm [shape: f32[16,128], index: 6, kind: output, shape index: {}]  }
   0x1   :  { %13 = vsyncpa [#allocation3 + $0x1], 0 }
   0x2   :  { %14 = vsyncpa [#allocation4], 0 }
   0x3   :  { %16 = vsyncpa [#allocation4 + $0x1], 0  ;;  %s882_s21 = smov 0   ;;  %s884_s22 = smov 0  }
   0x4   :  { %s886_s23 = smov 0   ;;  %s888_s24 = smov 0  }
   0x5 LB: > { %s903_s25 = sadd.s32 4294967295, %s845_s24   ;;  %s600_s26 = sadd.s32 4294967294, %s845_s24   ;;  %s845_s24 = sphi %s888_s24, %s1140_s24   ;;  %s841_s23 = sphi %s886_s23, %s1139_s23   ;;  %s837_s22 = sphi %s884_s22, %s1138_s22   ;;  %s833_s21 = sphi %s882_s21, %s1137_s21  }
   0x6   : > { %s907_s27 = sadd.s32 1, %s845_s24   ;;  %s29_s28 = sadd.s32 1, %s841_s23 }
   0x7   : > { %s26_s29 = ssub.s32 %s845_s24, %s907_s27  ;;  %p36_p0 = scmp.ne.s32.totalorder %s841_s23, %s837_s22 }
   0x8   : > { %p27_p1 = scmp.eq.s32.totalorder %s26_s29, 0  ;;  %p37_p2 = scmp.eq.s32.totalorder %s845_s24, 0 }
   0x9   : > { %p42_p3 = scmp.ne.s32.totalorder %s837_s22, %s833_s21  ;;  %p43_p4 = scmp.eq.s32.totalorder %s903_s25, 0 }
   0xa   : > { %s919_s30 = scalar_select %p27_p1, %s841_s23, %s29_s28  }
   0xb   : > { %p921_p5 = por %p37_p2, %p36_p0  ;;  %p925_p6 = por %p43_p4, %p42_p3 }
   0xc   : > { %p171_p7 = scmp.eq.s32.totalorder %s903_s25, 1  ;;  %p177_p8 = scmp.eq.s32.totalorder %s600_s26, 1 }
   0xd   : > { %p705_p10 = scmp.lt.s32.totalorder %s845_s24, 2  ;;  %s212_s11 = sand.u32 1, %s841_s23  }
   0xe   : > { %p932_p11 = por %p171_p7, %p36_p0  ;;  %p936_p12 = por %p177_p8, %p42_p3 }
   0xf   : > { %s604_s12 = sshll.u32 %s845_s24, 3  ;;  %s603_s13 = sshll.u32 %s212_s11, 3 }
  0x10   : > { %s220_s16 = scalar_lea.hbm %s1124_s0, %s604_s12  ;;  %s216_s18 = scalar_lea.vmem [#allocation2], %s603_s13 }
  0x11   : > { %s222_s17 = sshll.u32 %s220_s16, 4  ;;  %s224_s19 = sshll.u32 %s216_s18, 4  ;;  %s223_s17 = int_to_ptr.hbm [resolvable:$true] %s222_s17  ;;  %s225_s19 = int_to_ptr.vmem [resolvable:$true] %s224_s19 }
  0x12   : > { %p947_p13 = pnand %p705_p10, %p921_p5  ;;  %p605_p0 = scmp.ge.s32.totalorder %s845_s24, 1 }
  0x13   : > { %p229_p1 = scmp.lt.s32.totalorder %s845_s24, 3  ;;  %s213_s26 = scalar_lea.sflag [#allocation3], %s212_s11 }
  0x14   : > { %s749_s28 = sshra.s32 %s223_s17, 4  ;;  %p753_p3 = pneg %p947_p13  ;;  %s750_s28 = int_to_ptr.hbm [resolvable:$true] %s749_s28 }
  0x15   : > { %s751_s29 = scalar_lea.hbm %s750_s28, 8  ;;  %s756_s7 = scalar_lea.hbm %s1124_s0, 16 }
  0x16   : > { %p752_p2 = scmp.ne.s32.totalorder %s750_s28, %s751_s29  ;;  %p757_p5 = scmp.lt.s32.totalorder %s750_s28, %s1124_s0 }
  0x17   : > { %p758_p8 = scmp.lt.s32.totalorder %s756_s7, %s751_s29 }
  0x18   : > { %p754_p4 = pnand %p753_p3, %p752_p2 }
  0x19   : > { %p759_p10 = por %p758_p8, %p757_p5 }
  0x1a   : > { %p755_p7 = pneg %p754_p4 }
  0x1c   : > { %p760_p9 = pnand %p759_p10, %p755_p7 }
  0x1e   : > { %763 = shalt.err (!%p760_p9)
}
  0x1f   : > { %700 = dma.hbm_to_vmem [thread:$0]  (!%p947_p13), %s223_s17, 128, %s225_s19, %s213_s26  }
  0x20   : > { %p230_p2 = pnand %p605_p0, %p229_p1 }
  0x21   : > { %s968_s11 = sand.u32 (!%p230_p2), 1, %s837_s22  }
  0x22   : > { %233 = sbr.rel (%p230_p2) target bundleno = 743 (0x2e7), region = 44  ;;  %s606_s16 = sshll.u32 (!%p230_p2), %s968_s11, 3 }
  0x23   : > { %s236_s18 = scalar_lea.sflag (!%p230_p2), [#allocation3], %s968_s11  ;;  %s974_s28 = scalar_lea.vmem (!%p230_p2), [#allocation2], %s606_s16 }
  0x27   : > { %824 = dma.done.wait (%p925_p6), %s236_s18, 128  }
  0x28   : > { %826 = vsyncadd (%p925_p6), %s236_s18, 4294967168  ;;  %v285_v0 = vld [vmem:[%s1125_s1 + $0x78] sm:$0xff]  ;;  %v284_v1 = vld [vmem:[%s1125_s1 + $0x70] sm:$0xff]  ;;  %vm312_vm0 = vcmask 64512   ;;  %s674_s7 = sshll.u32 %s903_s25, 3  ;;  %s268_s15 = scalar_lea.vmem [#allocation5], %s606_s16 }
  0x29   : > { %290 = vmatpush.msra.mxu0 %v285_v0  ;;  %v283_v2 = vld [vmem:[%s1125_s1 + $0x68] sm:$0xff]  ;;  %v282_v3 = vld [vmem:[%s1125_s1 + $0x60] sm:$0xff]  ;;  %v281_v4 = vld [vmem:[%s1125_s1 + $0x58] sm:$0xff]  ;;  %s527_s18 = sshll.u32 %s268_s15, 4  ;;  %s515_s19 = scalar_lea.sflag [#allocation4], %s968_s11  ;;  %s528_s18 = int_to_ptr.vmem [resolvable:$true] %s527_s18 }
  0x2a   : > { %v280_v5 = vld [vmem:[%s1125_s1 + $0x50] sm:$0xff]  ;;  %v279_v6 = vld [vmem:[%s1125_s1 + $0x48] sm:$0xff]  ;;  %v278_v7 = vld [vmem:[%s1125_s1 + $0x40] sm:$0xff]  ;;  %s799_s12 = scalar_lea.hbm %s1130_s6, 16 }
  0x2b   : > { %291 = vmatpush.msra.mxu0 %v284_v1  ;;  %v277_v8 = vld [vmem:[%s1125_s1 + $0x38] sm:$0xff]  ;;  %v276_v9 = vld [vmem:[%s1125_s1 + $0x30] sm:$0xff]  ;;  %v275_v10 = vld [vmem:[%s1125_s1 + $0x28] sm:$0xff] }
  0x2c   : > { %v274_v11 = vld [vmem:[%s1125_s1 + $0x20] sm:$0xff]  ;;  %v273_v12 = vld [vmem:[%s1125_s1 + $0x18] sm:$0xff]  ;;  %v272_v13 = vld [vmem:[%s1125_s1 + $0x10] sm:$0xff] }
  0x2d   : > { %292 = vmatpush.msra.mxu0 %v283_v2  ;;  %v271_v14 = vld [vmem:[%s1125_s1 + $0x8] sm:$0xff]  ;;  %v270_v15 = vld [vmem:[%s1125_s1] sm:$0xff]  ;;  %v692_v29 = vld [vmem:[%s1128_s4 + $0x78] sm:$0xff] }
  0x2e   : > { %v269_v16 = vld [vmem:[%s974_s28] sm:$0xff]  ;;  %v684_v30 = vld [vmem:[%s1128_s4 + $0x38] sm:$0xff]  ;;  %433 = vmatpush.bf16.msra.mxu2 %v692_v29  ;;  %v691_v31 = vld [vmem:[%s1128_s4 + $0x70] sm:$0xff]  ;;  %s525_s28 = scalar_lea.hbm %s1130_s6, %s674_s7 }
  0x2f   : > { %293 = vmatpush.msra.mxu0 %v282_v3  ;;  %v739_v17 = vld [vmem:[%s1126_s2] ss:$0 sm:$0xff]  ;;  %494 = vmatpush.bf16.msra.mxu3 %v684_v30  ;;  %v683_v32 = vld [vmem:[%s1128_s4 + $0x30] sm:$0xff]  ;;  %v690_v33 = vld [vmem:[%s1128_s4 + $0x68] sm:$0xff]  ;;  %v384_v49 = vpack.c.bf16 %v269_v16, %v269_v16  ;;  %s529_s17 = sshll.u32 %s525_s28, 4  ;;  %s530_s17 = int_to_ptr.hbm [resolvable:$true] %s529_s17 }
  0x30   : > { %v327_v28 = vld [vmem:[%s1127_s3] sm:$0xff]  ;;  %v682_v34 = vld [vmem:[%s1128_s4 + $0x28] sm:$0xff]  ;;  %v688_v37 = vld [vmem:[%s1128_s4 + $0x58] sm:$0xff]  ;;  %s793_s20 = sshra.s32 %s530_s17, 4  ;;  %s794_s20 = int_to_ptr.hbm [resolvable:$true] %s793_s20 }
  0x31   : > { %294 = vmatpush.msra.mxu0 %v281_v4  ;;  %346 = vmatpush.msra.mxu1 %v327_v28  ;;  %v689_v35 = vld [vmem:[%s1128_s4 + $0x60] sm:$0xff]  ;;  %v680_v38 = vld [vmem:[%s1128_s4 + $0x18] sm:$0xff]  ;;  %v687_v40 = vld [vmem:[%s1128_s4 + $0x50] sm:$0xff]  ;;  %s795_s25 = scalar_lea.hbm %s794_s20, 8  ;;  %p800_p0 = scmp.lt.s32.totalorder %s794_s20, %s1130_s6 }
  0x32   : > { %434 = vmatpush.bf16.msra.mxu2 %v691_v31  ;;  %v681_v36 = vld [vmem:[%s1128_s4 + $0x20] sm:$0xff]  ;;  %v679_v41 = vld [vmem:[%s1128_s4 + $0x10] sm:$0xff]  ;;  %v686_v42 = vld [vmem:[%s1128_s4 + $0x48] sm:$0xff]  ;;  %p796_p6 = scmp.ne.s32.totalorder %s794_s20, %s795_s25  ;;  %p801_p1 = scmp.lt.s32.totalorder %s799_s12, %s795_s25 }
  0x33   : > { %295 = vmatpush.msra.mxu0 %v280_v5  ;;  %495 = vmatpush.bf16.msra.mxu3 %v683_v32  ;;  %v678_v44 = vld [vmem:[%s1128_s4 + $0x8] sm:$0xff]  ;;  %v685_v47 = vld [vmem:[%s1128_s4 + $0x40] sm:$0xff] }
  0x34   : > { %v677_v51 = vld [vmem:[%s1128_s4] sm:$0xff]  ;;  %p797_p9 = pnand %p796_p6, %p932_p11  ;;  %p802_p3 = por %p801_p1, %p800_p0 }
  0x35   : > { %296 = vmatpush.msra.mxu0 %v279_v6  ;;  %v740_v56 = vld [vmem:[%s1129_s5] ss:$0 sm:$0xff] }
  0x36   : > { %435 = vmatpush.bf16.msra.mxu2 %v690_v33  ;;  %p798_p13 = pneg %p797_p9 }
  0x37   : > { %297 = vmatpush.msra.mxu0 %v278_v7  ;;  %496 = vmatpush.bf16.msra.mxu3 %v682_v34 }
  0x38   : > { %p803_p4 = pnand %p802_p3, %p798_p13 }
  0x39   : > { %298 = vmatpush.msra.mxu0 %v277_v8 }
  0x3a   : > { %436 = vmatpush.bf16.msra.mxu2 %v689_v35 }
  0x3b   : > { %299 = vmatpush.msra.mxu0 %v276_v9  ;;  %497 = vmatpush.bf16.msra.mxu3 %v681_v36 }
  0x3d   : > { %300 = vmatpush.msra.mxu0 %v275_v10 }
  0x3e   : > { %437 = vmatpush.bf16.msra.mxu2 %v688_v37 }
  0x3f   : > { %301 = vmatpush.msra.mxu0 %v274_v11  ;;  %498 = vmatpush.bf16.msra.mxu3 %v680_v38 }
  0x41   : > { %302 = vmatpush.msra.mxu0 %v273_v12 }
  0x42   : > { %438 = vmatpush.bf16.msra.mxu2 %v687_v40 }
  0x43   : > { %303 = vmatpush.msra.mxu0 %v272_v13  ;;  %499 = vmatpush.bf16.msra.mxu3 %v679_v41 }
  0x45   : > { %304 = vmatpush.msra.mxu0 %v271_v14 }
  0x46   : > { %439 = vmatpush.bf16.msra.mxu2 %v686_v42 }
  0x47   : > { %305 = vmatpush.msra.mxu0 %v270_v15  ;;  %500 = vmatpush.bf16.msra.mxu3 %v678_v44 }
  0x48   : > { %306 = vmatmul.f32.vlgmr.msra.gmra.mxu0 %v269_v16 }
  0x4a   : > { %440 = vmatpush.bf16.msra.mxu2 %v685_v47 }
  0x4b   : > { %501 = vmatpush.bf16.msra.mxu3 %v677_v51 }
  0x4d   : > { %441 = vmatmul.bf16.vlgmr.msra.gmra.mxu2 %v384_v49 }
  0xc5   : > { %v307_v18 = vpop.f32.mrf.mxu0 }
  0xc6   : > { %v308_v19 = vadd.f32 %v739_v17, %v307_v18 }
  0xc8   : > { %v310_v20 = vmul.f32 1.442695, %v308_v19 }
  0xca   : > { %741 = vpow2.f32 %v310_v20 }
  0xd0   : > { %v742_v21 = vpop.eup %741  ;;  %v442_v54 = vpop.f32.mrf.mxu2 }
  0xd1   : > { %v313_v22 = vsel %vm312_vm0, %v742_v21, -inf }
  0xd2   : > { %314 = vmax.xlane.f32.xlu0 %v313_v22 }
  0xd8   : > { %v444_v55 = vpop.f32.mrf.mxu2 }
 0x145   : > { %v315_v23 = vpop.xlane.xlu0 %314 }
 0x146   : > { %v316_v24 = vsub.f32 %v742_v21, %v315_v23 }
 0x148   : > { %v317_v25 = vmul.f32 1.442695, %v316_v24 }
 0x14a   : > { %743 = vpow2.f32 %v317_v25 }
 0x150   : > { %v744_v26 = vpop.eup %743 }
 0x151   : > { %v319_v27 = vsel %vm312_vm0, %v744_v26, 0.0 }
 0x152   : > { %320 = vadd.xlane.f32.xlu0 %v319_v27 }
 0x1c5   : > { %v321_v39 = vpop.xlane.xlu0 %320 }
 0x1c6   : > { %745 = vrcp.f32 %v321_v39 }
 0x1cc   : > { %v746_v43 = vpop.eup %745 }
 0x1cd   : > { %v323_v45 = vmul.f32 %v746_v43, %v321_v39 }
 0x1cf   : > { %v324_v46 = vsub.f32 2.0, %v323_v45 }
 0x1d1   : > { %v325_v48 = vmul.f32 %v746_v43, %v324_v46 }
 0x1d3   : > { %v326_v50 = vmul.f32 %v744_v26, %v325_v48 }
 0x1d5   : > { %608 = vmatmul.msk.f32.vlgmr.msra.gmra.mxu1 %vm312_vm0, %v326_v50 }
 0x252   : > { %v348_v52 = vpop.f32.mrf.mxu1 }
 0x253   : > { %v383_v53 = vpack.c.bf16 %v348_v52, %v348_v52 }
 0x255   : > { %502 = vmatmul.bf16.vlgmr.msra.gmra.mxu3 %v383_v53 }
 0x2d8   : > { %v503_v57 = vpop.f32.mrf.mxu3 }
 0x2d9   : > { %v504_v58 = vadd.f32 %v503_v57, %v442_v54 }
 0x2db   : > { %v511_v59 = vadd.f32 %v740_v56, %v504_v58 }
 0x2dd   : > { %747 = vtanh.f32 %v511_v59 }
 0x2e0   : > { %v505_v60 = vpop.f32.mrf.mxu3 }
 0x2e3   : > { %v748_v61 = vpop.eup %747 }
 0x2e4   : > { %513 = vst [vmem:[%s268_s15] sm:$0xff] %v748_v61 }
 0x2e5   : > { %806 = shalt.err (!%p803_p4)
}
 0x2e6   : > { %695 = dma.vmem_to_hbm [thread:$0]  (%p932_p11), %s528_s18, 128, %s530_s17, %s515_s19  }
 0x2e7 PF: > { %s541_s11 = sand.u32 1, %s833_s21   ;;  %p1136_p7 = scmp.ge.s32.totalorder %s845_s24, 2 }
 0x2e8   : > { %s542_s7 = scalar_lea.sflag [#allocation4], %s541_s11 }
 0x2e9   : > { %p702_p5 = pnand %p1136_p7, %p936_p12 }
 0x2eb   : > { %p703_p8 = pneg %p702_p5 }
 0x2ed   : > { %828 = dma.done.wait (%p703_p8), %s542_s7, 128  }
 0x2ee   : > { %830 = vsyncadd (%p703_p8), %s542_s7, 4294967168  ;;  %p19_p10 = scmp.ge.s32.totalorder %s907_s27, 4   ;;  %s1137_s21 = smov %s837_s22 }
 0x2ef   : > { %s1138_s22 = smov %s841_s23  ;;  %s1139_s23 = smov %s919_s30 }
 0x2f0   : > { %s1140_s24 = smov %s907_s27  ;;  %21 = sbr.rel (!%p19_p10) target bundleno = 5 (0x5), region = 89 }
 0x2f5   :  { %548 = vsyncpa [#allocation3], 1 }
 0x2f6   :  { %550 = vsyncpa [#allocation3 + $0x1], 1 }
 0x2f7   :  { %551 = vsyncpa [#allocation4], 1 }
 0x2f8   :  { %553 = vsyncpa [#allocation4 + $0x1], 1 }

// kernel: tpu_custom_call.1
= control target key start
LH: loop header
LB: loop body
LE: loop exit
PB: predicated region body
PF: predicated region fallthrough
CT: control target
= control target key end

     0   :  { %11 = vsyncpa [#allocation3], 0  ;;  %s1124_s0 = inlined_call_operand.hbm [shape: f32[16,128], index: 0, kind: input, shape index: {}]   ;;  %s1125_s1 = inlined_call_operand.vmem [shape: f32[128,8], index: 1, kind: input, shape index: {}]   ;;  %s1126_s2 = inlined_call_operand.vmem [shape: f32[1,8], index: 2, kind: input, shape index: {}]   ;;  %s1127_s3 = inlined_call_operand.vmem [shape: f32[8,128], index: 3, kind: input, shape index: {}]   ;;  %s1128_s4 = inlined_call_operand.vmem [shape: bf16[256,128], index: 4, kind: input, shape index: {}]   ;;  %s1129_s5 = inlined_call_operand.vmem [shape: f32[1,128], index: 5, kind: input, shape index: {}]   ;;  %s1130_s6 = inlined_call_operand.hbm [shape: f32[16,128], index: 6, kind: output, shape index: {}]  }
   0x1   :  { %13 = vsyncpa [#allocation3 + $0x1], 0 }
   0x2   :  { %14 = vsyncpa [#allocation4], 0 }
   0x3   :  { %16 = vsyncpa [#allocation4 + $0x1], 0  ;;  %s882_s21 = smov 0   ;;  %s884_s22 = smov 0  }
   0x4   :  { %s886_s23 = smov 0   ;;  %s888_s24 = smov 0  }
   0x5 LB: > { %s903_s25 = sadd.s32 4294967295, %s845_s24   ;;  %s600_s26 = sadd.s32 4294967294, %s845_s24   ;;  %s845_s24 = sphi %s888_s24, %s1140_s24   ;;  %s841_s23 = sphi %s886_s23, %s1139_s23   ;;  %s837_s22 = sphi %s884_s22, %s1138_s22   ;;  %s833_s21 = sphi %s882_s21, %s1137_s21  }
   0x6   : > { %s907_s27 = sadd.s32 1, %s845_s24   ;;  %s29_s28 = sadd.s32 1, %s841_s23 }
   0x7   : > { %s26_s29 = ssub.s32 %s845_s24, %s907_s27  ;;  %p36_p0 = scmp.ne.s32.totalorder %s841_s23, %s837_s22 }
   0x8   : > { %p27_p1 = scmp.eq.s32.totalorder %s26_s29, 0  ;;  %p37_p2 = scmp.eq.s32.totalorder %s845_s24, 0 }
   0x9   : > { %p42_p3 = scmp.ne.s32.totalorder %s837_s22, %s833_s21  ;;  %p43_p4 = scmp.eq.s32.totalorder %s903_s25, 0 }
   0xa   : > { %s919_s30 = scalar_select %p27_p1, %s841_s23, %s29_s28  }
   0xb   : > { %p921_p5 = por %p37_p2, %p36_p0  ;;  %p925_p6 = por %p43_p4, %p42_p3 }
   0xc   : > { %p171_p7 = scmp.eq.s32.totalorder %s903_s25, 1  ;;  %p177_p8 = scmp.eq.s32.totalorder %s600_s26, 1 }
   0xd   : > { %p705_p10 = scmp.lt.s32.totalorder %s845_s24, 2  ;;  %s212_s11 = sand.u32 1, %s841_s23  }
   0xe   : > { %p932_p11 = por %p171_p7, %p36_p0  ;;  %p936_p12 = por %p177_p8, %p42_p3 }
   0xf   : > { %s604_s12 = sshll.u32 %s845_s24, 3  ;;  %s603_s13 = sshll.u32 %s212_s11, 3 }
  0x10   : > { %s220_s16 = scalar_lea.hbm %s1124_s0, %s604_s12  ;;  %s216_s18 = scalar_lea.vmem [#allocation2], %s603_s13 }
  0x11   : > { %s222_s17 = sshll.u32 %s220_s16, 4  ;;  %s224_s19 = sshll.u32 %s216_s18, 4  ;;  %s223_s17 = int_to_ptr.hbm [resolvable:$true] %s222_s17  ;;  %s225_s19 = int_to_ptr.vmem [resolvable:$true] %s224_s19 }
  0x12   : > { %p947_p13 = pnand %p705_p10, %p921_p5  ;;  %p605_p0 = scmp.ge.s32.totalorder %s845_s24, 1 }
  0x13   : > { %p229_p1 = scmp.lt.s32.totalorder %s845_s24, 3  ;;  %s213_s26 = scalar_lea.sflag [#allocation3], %s212_s11 }
  0x14   : > { %s749_s28 = sshra.s32 %s223_s17, 4  ;;  %p753_p3 = pneg %p947_p13  ;;  %s750_s28 = int_to_ptr.hbm [resolvable:$true] %s749_s28 }
  0x15   : > { %s751_s29 = scalar_lea.hbm %s750_s28, 8  ;;  %s756_s7 = scalar_lea.hbm %s1124_s0, 16 }
  0x16   : > { %p752_p2 = scmp.ne.s32.totalorder %s750_s28, %s751_s29  ;;  %p757_p5 = scmp.lt.s32.totalorder %s750_s28, %s1124_s0 }
  0x17   : > { %p758_p8 = scmp.lt.s32.totalorder %s756_s7, %s751_s29 }
  0x18   : > { %p754_p4 = pnand %p753_p3, %p752_p2 }
  0x19   : > { %p759_p10 = por %p758_p8, %p757_p5 }
  0x1a   : > { %p755_p7 = pneg %p754_p4 }
  0x1c   : > { %p760_p9 = pnand %p759_p10, %p755_p7 }
  0x1e   : > { %763 = shalt.err (!%p760_p9)
}
  0x1f   : > { %700 = dma.hbm_to_vmem [thread:$0]  (!%p947_p13), %s223_s17, 128, %s225_s19, %s213_s26  }
  0x20   : > { %p230_p2 = pnand %p605_p0, %p229_p1 }
  0x21   : > { %s968_s11 = sand.u32 (!%p230_p2), 1, %s837_s22  }
  0x22   : > { %233 = sbr.rel (%p230_p2) target bundleno = 743 (0x2e7), region = 44  ;;  %s606_s16 = sshll.u32 (!%p230_p2), %s968_s11, 3 }
  0x23   : > { %s236_s18 = scalar_lea.sflag (!%p230_p2), [#allocation3], %s968_s11  ;;  %s974_s28 = scalar_lea.vmem (!%p230_p2), [#allocation2], %s606_s16 }
  0x27   : > { %824 = dma.done.wait (%p925_p6), %s236_s18, 128  }
  0x28   : > { %826 = vsyncadd (%p925_p6), %s236_s18, 4294967168  ;;  %v285_v0 = vld [vmem:[%s1125_s1 + $0x78] sm:$0xff]  ;;  %v284_v1 = vld [vmem:[%s1125_s1 + $0x70] sm:$0xff]  ;;  %vm312_vm0 = vcmask 64512   ;;  %s674_s7 = sshll.u32 %s903_s25, 3  ;;  %s268_s15 = scalar_lea.vmem [#allocation5], %s606_s16 }
  0x29   : > { %290 = vmatpush.msra.mxu0 %v285_v0  ;;  %v283_v2 = vld [vmem:[%s1125_s1 + $0x68] sm:$0xff]  ;;  %v282_v3 = vld [vmem:[%s1125_s1 + $0x60] sm:$0xff]  ;;  %v281_v4 = vld [vmem:[%s1125_s1 + $0x58] sm:$0xff]  ;;  %s527_s18 = sshll.u32 %s268_s15, 4  ;;  %s515_s19 = scalar_lea.sflag [#allocation4], %s968_s11  ;;  %s528_s18 = int_to_ptr.vmem [resolvable:$true] %s527_s18 }
  0x2a   : > { %v280_v5 = vld [vmem:[%s1125_s1 + $0x50] sm:$0xff]  ;;  %v279_v6 = vld [vmem:[%s1125_s1 + $0x48] sm:$0xff]  ;;  %v278_v7 = vld [vmem:[%s1125_s1 + $0x40] sm:$0xff]  ;;  %s799_s12 = scalar_lea.hbm %s1130_s6, 16 }
  0x2b   : > { %291 = vmatpush.msra.mxu0 %v284_v1  ;;  %v277_v8 = vld [vmem:[%s1125_s1 + $0x38] sm:$0xff]  ;;  %v276_v9 = vld [vmem:[%s1125_s1 + $0x30] sm:$0xff]  ;;  %v275_v10 = vld [vmem:[%s1125_s1 + $0x28] sm:$0xff] }
  0x2c   : > { %v274_v11 = vld [vmem:[%s1125_s1 + $0x20] sm:$0xff]  ;;  %v273_v12 = vld [vmem:[%s1125_s1 + $0x18] sm:$0xff]  ;;  %v272_v13 = vld [vmem:[%s1125_s1 + $0x10] sm:$0xff] }
  0x2d   : > { %292 = vmatpush.msra.mxu0 %v283_v2  ;;  %v271_v14 = vld [vmem:[%s1125_s1 + $0x8] sm:$0xff]  ;;  %v270_v15 = vld [vmem:[%s1125_s1] sm:$0xff]  ;;  %v692_v29 = vld [vmem:[%s1128_s4 + $0x78] sm:$0xff] }
  0x2e   : > { %v269_v16 = vld [vmem:[%s974_s28] sm:$0xff]  ;;  %v684_v30 = vld [vmem:[%s1128_s4 + $0x38] sm:$0xff]  ;;  %433 = vmatpush.bf16.msra.mxu2 %v692_v29  ;;  %v691_v31 = vld [vmem:[%s1128_s4 + $0x70] sm:$0xff]  ;;  %s525_s28 = scalar_lea.hbm %s1130_s6, %s674_s7 }
  0x2f   : > { %293 = vmatpush.msra.mxu0 %v282_v3  ;;  %v739_v17 = vld [vmem:[%s1126_s2] ss:$0 sm:$0xff]  ;;  %494 = vmatpush.bf16.msra.mxu3 %v684_v30  ;;  %v683_v32 = vld [vmem:[%s1128_s4 + $0x30] sm:$0xff]  ;;  %v690_v33 = vld [vmem:[%s1128_s4 + $0x68] sm:$0xff]  ;;  %v384_v49 = vpack.c.bf16 %v269_v16, %v269_v16  ;;  %s529_s17 = sshll.u32 %s525_s28, 4  ;;  %s530_s17 = int_to_ptr.hbm [resolvable:$true] %s529_s17 }
  0x30   : > { %v327_v28 = vld [vmem:[%s1127_s3] sm:$0xff]  ;;  %v682_v34 = vld [vmem:[%s1128_s4 + $0x28] sm:$0xff]  ;;  %v688_v37 = vld [vmem:[%s1128_s4 + $0x58] sm:$0xff]  ;;  %s793_s20 = sshra.s32 %s530_s17, 4  ;;  %s794_s20 = int_to_ptr.hbm [resolvable:$true] %s793_s20 }
  0x31   : > { %294 = vmatpush.msra.mxu0 %v281_v4  ;;  %346 = vmatpush.msra.mxu1 %v327_v28  ;;  %v689_v35 = vld [vmem:[%s1128_s4 + $0x60] sm:$0xff]  ;;  %v680_v38 = vld [vmem:[%s1128_s4 + $0x18] sm:$0xff]  ;;  %v687_v40 = vld [vmem:[%s1128_s4 + $0x50] sm:$0xff]  ;;  %s795_s25 = scalar_lea.hbm %s794_s20, 8  ;;  %p800_p0 = scmp.lt.s32.totalorder %s794_s20, %s1130_s6 }
  0x32   : > { %434 = vmatpush.bf16.msra.mxu2 %v691_v31  ;;  %v681_v36 = vld [vmem:[%s1128_s4 + $0x20] sm:$0xff]  ;;  %v679_v41 = vld [vmem:[%s1128_s4 + $0x10] sm:$0xff]  ;;  %v686_v42 = vld [vmem:[%s1128_s4 + $0x48] sm:$0xff]  ;;  %p796_p6 = scmp.ne.s32.totalorder %s794_s20, %s795_s25  ;;  %p801_p1 = scmp.lt.s32.totalorder %s799_s12, %s795_s25 }
  0x33   : > { %295 = vmatpush.msra.mxu0 %v280_v5  ;;  %495 = vmatpush.bf16.msra.mxu3 %v683_v32  ;;  %v678_v44 = vld [vmem:[%s1128_s4 + $0x8] sm:$0xff]  ;;  %v685_v47 = vld [vmem:[%s1128_s4 + $0x40] sm:$0xff] }
  0x34   : > { %v677_v51 = vld [vmem:[%s1128_s4] sm:$0xff]  ;;  %p797_p9 = pnand %p796_p6, %p932_p11  ;;  %p802_p3 = por %p801_p1, %p800_p0 }
  0x35   : > { %296 = vmatpush.msra.mxu0 %v279_v6  ;;  %v740_v56 = vld [vmem:[%s1129_s5] ss:$0 sm:$0xff] }
  0x36   : > { %435 = vmatpush.bf16.msra.mxu2 %v690_v33  ;;  %p798_p13 = pneg %p797_p9 }
  0x37   : > { %297 = vmatpush.msra.mxu0 %v278_v7  ;;  %496 = vmatpush.bf16.msra.mxu3 %v682_v34 }
  0x38   : > { %p803_p4 = pnand %p802_p3, %p798_p13 }
  0x39   : > { %298 = vmatpush.msra.mxu0 %v277_v8 }
  0x3a   : > { %436 = vmatpush.bf16.msra.mxu2 %v689_v35 }
  0x3b   : > { %299 = vmatpush.msra.mxu0 %v276_v9  ;;  %497 = vmatpush.bf16.msra.mxu3 %v681_v36 }
  0x3d   : > { %300 = vmatpush.msra.mxu0 %v275_v10 }
  0x3e   : > { %437 = vmatpush.bf16.msra.mxu2 %v688_v37 }
  0x3f   : > { %301 = vmatpush.msra.mxu0 %v274_v11  ;;  %498 = vmatpush.bf16.msra.mxu3 %v680_v38 }
  0x41   : > { %302 = vmatpush.msra.mxu0 %v273_v12 }
  0x42   : > { %438 = vmatpush.bf16.msra.mxu2 %v687_v40 }
  0x43   : > { %303 = vmatpush.msra.mxu0 %v272_v13  ;;  %499 = vmatpush.bf16.msra.mxu3 %v679_v41 }
  0x45   : > { %304 = vmatpush.msra.mxu0 %v271_v14 }
  0x46   : > { %439 = vmatpush.bf16.msra.mxu2 %v686_v42 }
  0x47   : > { %305 = vmatpush.msra.mxu0 %v270_v15  ;;  %500 = vmatpush.bf16.msra.mxu3 %v678_v44 }
  0x48   : > { %306 = vmatmul.f32.vlgmr.msra.gmra.mxu0 %v269_v16 }
  0x4a   : > { %440 = vmatpush.bf16.msra.mxu2 %v685_v47 }
  0x4b   : > { %501 = vmatpush.bf16.msra.mxu3 %v677_v51 }
  0x4d   : > { %441 = vmatmul.bf16.vlgmr.msra.gmra.mxu2 %v384_v49 }
  0xc5   : > { %v307_v18 = vpop.f32.mrf.mxu0 }
  0xc6   : > { %v308_v19 = vadd.f32 %v739_v17, %v307_v18 }
  0xc8   : > { %v310_v20 = vmul.f32 1.442695, %v308_v19 }
  0xca   : > { %741 = vpow2.f32 %v310_v20 }
  0xd0   : > { %v742_v21 = vpop.eup %741  ;;  %v442_v54 = vpop.f32.mrf.mxu2 }
  0xd1   : > { %v313_v22 = vsel %vm312_vm0, %v742_v21, -inf }
  0xd2   : > { %314 = vmax.xlane.f32.xlu0 %v313_v22 }
  0xd8   : > { %v444_v55 = vpop.f32.mrf.mxu2 }
 0x145   : > { %v315_v23 = vpop.xlane.xlu0 %314 }
 0x146   : > { %v316_v24 = vsub.f32 %v742_v21, %v315_v23 }
 0x148   : > { %v317_v25 = vmul.f32 1.442695, %v316_v24 }
 0x14a   : > { %743 = vpow2.f32 %v317_v25 }
 0x150   : > { %v744_v26 = vpop.eup %743 }
 0x151   : > { %v319_v27 = vsel %vm312_vm0, %v744_v26, 0.0 }
 0x152   : > { %320 = vadd.xlane.f32.xlu0 %v319_v27 }
 0x1c5   : > { %v321_v39 = vpop.xlane.xlu0 %320 }
 0x1c6   : > { %745 = vrcp.f32 %v321_v39 }
 0x1cc   : > { %v746_v43 = vpop.eup %745 }
 0x1cd   : > { %v323_v45 = vmul.f32 %v746_v43, %v321_v39 }
 0x1cf   : > { %v324_v46 = vsub.f32 2.0, %v323_v45 }
 0x1d1   : > { %v325_v48 = vmul.f32 %v746_v43, %v324_v46 }
 0x1d3   : > { %v326_v50 = vmul.f32 %v744_v26, %v325_v48 }
 0x1d5   : > { %608 = vmatmul.msk.f32.vlgmr.msra.gmra.mxu1 %vm312_vm0, %v326_v50 }
 0x252   : > { %v348_v52 = vpop.f32.mrf.mxu1 }
 0x253   : > { %v383_v53 = vpack.c.bf16 %v348_v52, %v348_v52 }
 0x255   : > { %502 = vmatmul.bf16.vlgmr.msra.gmra.mxu3 %v383_v53 }
 0x2d8   : > { %v503_v57 = vpop.f32.mrf.mxu3 }
 0x2d9   : > { %v504_v58 = vadd.f32 %v503_v57, %v442_v54 }
 0x2db   : > { %v511_v59 = vadd.f32 %v740_v56, %v504_v58 }
 0x2dd   : > { %747 = vtanh.f32 %v511_v59 }
 0x2e0   : > { %v505_v60 = vpop.f32.mrf.mxu3 }
 0x2e3   : > { %v748_v61 = vpop.eup %747 }
 0x2e4   : > { %513 = vst [vmem:[%s268_s15] sm:$0xff] %v748_v61 }
 0x2e5   : > { %806 = shalt.err (!%p803_p4)
}
 0x2e6   : > { %695 = dma.vmem_to_hbm [thread:$0]  (%p932_p11), %s528_s18, 128, %s530_s17, %s515_s19  }
 0x2e7 PF: > { %s541_s11 = sand.u32 1, %s833_s21   ;;  %p1136_p7 = scmp.ge.s32.totalorder %s845_s24, 2 }
 0x2e8   : > { %s542_s7 = scalar_lea.sflag [#allocation4], %s541_s11 }
 0x2e9   : > { %p702_p5 = pnand %p1136_p7, %p936_p12 }
 0x2eb   : > { %p703_p8 = pneg %p702_p5 }
 0x2ed   : > { %828 = dma.done.wait (%p703_p8), %s542_s7, 128  }
 0x2ee   : > { %830 = vsyncadd (%p703_p8), %s542_s7, 4294967168  ;;  %p19_p10 = scmp.ge.s32.totalorder %s907_s27, 4   ;;  %s1137_s21 = smov %s837_s22 }
 0x2ef   : > { %s1138_s22 = smov %s841_s23  ;;  %s1139_s23 = smov %s919_s30 }
 0x2f0   : > { %s1140_s24 = smov %s907_s27  ;;  %21 = sbr.rel (!%p19_p10) target bundleno = 5 (0x5), region = 89 }
 0x2f5   :  { %548 = vsyncpa [#allocation3], 1 }
 0x2f6   :  { %550 = vsyncpa [#allocation3 + $0x1], 1 }
 0x2f7   :  { %551 = vsyncpa [#allocation4], 1 }
 0x2f8   :  { %553 = vsyncpa [#allocation4 + $0x1], 1 }

</bundles_post_ra>
